<compile_context>
chip_gen: v7x
topology: tpu7x:2x2x1
jax: 0.10.0
libtpu: 0.0.40
codegen_flags: <defaults>
</compile_context>

<pallas_src>
import functools

import jax
import jax.numpy as jnp
from jax.experimental import pallas as pl
from jax.experimental.pallas import tpu as pltpu


def _round_up(x, m):
    return ((x + m - 1) // m) * m


def policy_kernel(x_ref, w1_ref, b1_ref, w2_ref, b2_ref, out_ref):
    # fc1 + ReLU (shared hidden activation).  MXU accumulates in f32; the
    # bias add / ReLU stay in f32 (VPU), matching PyTorch semantics.
    h = jnp.dot(x_ref[...], w1_ref[...], preferred_element_type=jnp.float32)
    h = jnp.maximum(h + b1_ref[...], 0.0)

    # Fused (action | value) head: one MXU pass.  Cast the activation to the
    # weight dtype (bf16 when enabled) only for the matmul operand.
    h = h.astype(w2_ref.dtype)
    out = jnp.dot(h, w2_ref[...], preferred_element_type=jnp.float32)
    out_ref[...] = out + b2_ref[...]


def init_params(key, state_size, action_size, fc1_units, std=0.0):
    """Parameter init mirroring Policy.__init__/reset_parameters.

    Weights ~ Normal(0, 0.1); biases keep PyTorch's default
    Uniform(-1/sqrt(fan_in), 1/sqrt(fan_in)).  log_std = ones * std.
    Weights are stored transposed: (in_features, out_features).
    """
    k1, k2, k3, k4, k5, k6 = jax.random.split(key, 6)

    w1 = 0.1 * jax.random.normal(k1, (state_size, fc1_units), jnp.float32)
    w2v = 0.1 * jax.random.normal(k2, (fc1_units, 1), jnp.float32)
    w2a = 0.1 * jax.random.normal(k3, (fc1_units, action_size), jnp.float32)

    bound1 = 1.0 / jnp.sqrt(jnp.float32(state_size))
    bound2 = 1.0 / jnp.sqrt(jnp.float32(fc1_units))
    b1 = jax.random.uniform(k4, (1, fc1_units), jnp.float32, -bound1, bound1)
    b2v = jax.random.uniform(k5, (1, 1), jnp.float32, -bound2, bound2)
    b2a = jax.random.uniform(k6, (1, action_size), jnp.float32, -bound2, bound2)

    log_std = jnp.ones((1, action_size), jnp.float32) * std
    return (w1, b1, w2v, b2v, w2a, b2a, log_std)


def prepare_params(params, use_bf16=True):
    """One-time parameter preparation (outside the per-step path).

      * fuse the two heads: W2 = [W2a | W2v], b2 = [b2a | b2v]
      * zero-pad the hidden width to a multiple of 128 lanes (exact results)
      * optionally cast matmul operands to bf16 (biases stay f32)
      * precompute std = exp(log_std)
    """
    w1, b1, w2v, b2v, w2a, b2a, log_std = params
    state_size, fc1_units = w1.shape
    action_size = w2a.shape[1]

    h_pad = _round_up(fc1_units, 128)
    pad_h = h_pad - fc1_units

    w2 = jnp.concatenate([w2a, w2v], axis=1)          # (H, A+1)
    b2 = jnp.concatenate([b2a, b2v], axis=1)          # (1, A+1)

    w1p = jnp.pad(w1, ((0, 0), (0, pad_h)))           # (S, Hp)
    b1p = jnp.pad(b1, ((0, 0), (0, pad_h)))           # (1, Hp)
    w2p = jnp.pad(w2, ((0, pad_h), (0, 0)))           # (Hp, A+1)

    mm_dtype = jnp.bfloat16 if use_bf16 else jnp.float32
    w1p = w1p.astype(mm_dtype)
    w2p = w2p.astype(mm_dtype)

    std = jnp.exp(log_std)                            # (1, A) — state-independent

    return {
        "w1": w1p, "b1": b1p, "w2": w2p, "b2": b2, "std": std,
        "state_size": state_size, "action_size": action_size,
        "hidden_pad": h_pad, "mm_dtype": mm_dtype,
    }


def policy_forward(state, prep, tile_b_max=1024):
    """Fused Policy forward pass with a 1-D batch grid.

    Returns (mu, std, value) -- the Normal(mu, std) parameters and the value.

    TILE_B = min(tile_b_max, round_up(B, 8)); tile_b_max=1024 keeps the
    double-buffered tiles well inside v5e's 16 MiB default scoped VMEM and
    v7x's 64 MiB physical VMEM.  The batch axis is "parallel" so v7x's two
    TensorCores split it.
    """
    B, S = state.shape
    A = prep["action_size"]
    OUT = A + 1
    Hp = prep["hidden_pad"]
    mm_dtype = prep["mm_dtype"]

    # Tile / pad the batch so every tile is full (tail handled by padding).
    tile_b = min(tile_b_max, _round_up(B, 8))
    b_pad = _round_up(B, tile_b)
    x = state.astype(mm_dtype)
    if b_pad != B:
        x = jnp.pad(x, ((0, b_pad - B), (0, 0)))
    grid = (b_pad // tile_b,)

    itemsize = jnp.dtype(mm_dtype).itemsize
    cost = pl.CostEstimate(
        flops=2 * b_pad * (S * Hp + Hp * OUT),
        transcendentals=0,
        bytes_accessed=(b_pad * S * itemsize            # state in
                        + (S * Hp + Hp * OUT) * itemsize  # weights
                        + (Hp + OUT) * 4                  # biases (f32)
                        + b_pad * OUT * 4),               # output (f32)
    )

    out = pl.pallas_call(
        policy_kernel,
        out_shape=jax.ShapeDtypeStruct((b_pad, OUT), jnp.float32),
        grid_spec=pltpu.PrefetchScalarGridSpec(
            num_scalar_prefetch=0,
            grid=grid,
            in_specs=[
                pl.BlockSpec((tile_b, S), lambda i: (i, 0)),   # state tile
                pl.BlockSpec((S, Hp), lambda i: (0, 0)),       # W1 (resident)
                pl.BlockSpec((1, Hp), lambda i: (0, 0)),       # b1 (resident)
                pl.BlockSpec((Hp, OUT), lambda i: (0, 0)),     # W2 (resident)
                pl.BlockSpec((1, OUT), lambda i: (0, 0)),      # b2 (resident)
            ],
            out_specs=pl.BlockSpec((tile_b, OUT), lambda i: (i, 0)),
        ),
        compiler_params=pltpu.CompilerParams(
            dimension_semantics=("parallel",)),
        cost_estimate=cost,
    )(x, prep["w1"], prep["b1"], prep["w2"], prep["b2"])

    out = out[:B]
    mu = out[:, :A]
    value = out[:, A:A + 1]
    std = jnp.broadcast_to(prep["std"], mu.shape)
    return mu, std, value


def reference_forward(state, params):
    """Pure-JAX f32 reference for correctness checking."""
    w1, b1, w2v, b2v, w2a, b2a, log_std = params
    h = jnp.maximum(state @ w1 + b1, 0.0)
    value = h @ w2v + b2v
    mu = h @ w2a + b2a
    std = jnp.broadcast_to(jnp.exp(log_std), mu.shape)
    return mu, std, value


if __name__ == "__main__":
    # Small shapes consistent with the module's forward.
    batch = 8
    state_size = 8
    fc1_units = 32
    action_size = 4

    key = jax.random.PRNGKey(0)
    k_params, k_state, k_state2 = jax.random.split(key, 3)

    params = init_params(k_params, state_size, action_size, fc1_units, std=0.0)
    state = jax.random.normal(k_state, (batch, state_size), jnp.float32)
    mu_ref, std_ref, val_ref = reference_forward(state, params)

    # --- exact f32 path ------------------------------------------------
    prep_f32 = prepare_params(params, use_bf16=False)
    mu, std, value = policy_forward(state, prep_f32)
    jax.block_until_ready((mu, std, value))
    assert mu.shape == (batch, action_size)
    assert std.shape == (batch, action_size)
    assert value.shape == (batch, 1)
    assert jnp.allclose(mu, mu_ref, atol=1e-5, rtol=1e-5)
    assert jnp.allclose(std, std_ref, atol=1e-5, rtol=1e-5)
    assert jnp.allclose(value, val_ref, atol=1e-5, rtol=1e-5)

    # --- bf16 matmul-operand path (relaxed tolerance) --------------------
    prep_bf16 = prepare_params(params, use_bf16=True)
    mu_b, std_b, val_b = policy_forward(state, prep_bf16)
    jax.block_until_ready((mu_b, std_b, val_b))
    assert jnp.allclose(mu_b, mu_ref, atol=2e-2, rtol=2e-2)
    assert jnp.allclose(std_b, std_ref, atol=2e-2, rtol=2e-2)
    assert jnp.allclose(val_b, val_ref, atol=2e-2, rtol=2e-2)

    # --- multi-tile grid + ragged tail (exercise padding / batch grid) ---
    batch2 = 200
    state2 = jax.random.normal(k_state2, (batch2, state_size), jnp.float32)
    mu2_ref, std2_ref, val2_ref = reference_forward(state2, params)
    mu2, std2, val2 = policy_forward(state2, prep_f32, tile_b_max=64)
    jax.block_until_ready((mu2, std2, val2))
    assert mu2.shape == (batch2, action_size)
    assert val2.shape == (batch2, 1)
    assert jnp.allclose(mu2, mu2_ref, atol=1e-5, rtol=1e-5)
    assert jnp.allclose(std2, std2_ref, atol=1e-5, rtol=1e-5)
    assert jnp.allclose(val2, val2_ref, atol=1e-5, rtol=1e-5)

    print("KERNEL_OK")
</pallas_src>

<mosaic_0001>
module attributes {stable_mosaic.version = 11 : i64} {
  func.func @policy_kernel(%arg0: i32, %arg1: memref<8x8xf32, #tpu.memory_space<vmem>>, %arg2: memref<8x128xf32, #tpu.memory_space<vmem>>, %arg3: memref<1x128xf32, #tpu.memory_space<vmem>>, %arg4: memref<128x5xf32, #tpu.memory_space<vmem>>, %arg5: memref<1x5xf32, #tpu.memory_space<vmem>>, %arg6: memref<8x5xf32, #tpu.memory_space<vmem>>) attributes {dimension_semantics = [#tpu.dimension_semantics<parallel>], iteration_bounds = array<i64: 1>, scalar_prefetch = 0 : i64, scratch_operands = 0 : i64, tpu.core_type = #tpu.core_type<tc>, window_params = [{transform_indices = @transform_0, window_bounds = array<i64: 8, 8>}, {pipeline_mode = #tpu.pipeline_mode<synchronous>, transform_indices = @transform_1, window_bounds = array<i64: 8, 128>}, {pipeline_mode = #tpu.pipeline_mode<synchronous>, transform_indices = @transform_2, window_bounds = array<i64: 1, 128>}, {pipeline_mode = #tpu.pipeline_mode<synchronous>, transform_indices = @transform_3, window_bounds = array<i64: 128, 5>}, {pipeline_mode = #tpu.pipeline_mode<synchronous>, transform_indices = @transform_4, window_bounds = array<i64: 1, 5>}, {transform_indices = @transform_5, window_bounds = array<i64: 8, 5>}]} {
    %c0 = arith.constant 0 : index
    %c0_0 = arith.constant 0 : index
    %0 = vector.load %arg1[%c0, %c0_0] : memref<8x8xf32, #tpu.memory_space<vmem>>, vector<8x8xf32>
    %c0_1 = arith.constant 0 : index
    %c0_2 = arith.constant 0 : index
    %1 = vector.load %arg2[%c0_1, %c0_2] : memref<8x128xf32, #tpu.memory_space<vmem>>, vector<8x128xf32>
    %cst = arith.constant dense<0.000000e+00> : vector<8x128xf32>
    %2 = tpu.matmul %0, %1, %cst {dimension_numbers = #tpu.dot_dimension_numbers<[1], [0], [0], [1], [0, 0, 1, 1], [], []>} : vector<8x8xf32>, vector<8x128xf32>, vector<8x128xf32> -> vector<8x128xf32>
    %c0_3 = arith.constant 0 : index
    %c0_4 = arith.constant 0 : index
    %3 = vector.load %arg3[%c0_3, %c0_4] : memref<1x128xf32, #tpu.memory_space<vmem>>, vector<1x128xf32>
    %4 = vector.broadcast %3 : vector<1x128xf32> to vector<8x128xf32>
    %5 = arith.addf %2, %4 : vector<8x128xf32>
    %cst_5 = arith.constant 0.000000e+00 : f32
    %6 = vector.broadcast %cst_5 : f32 to vector<8x128xf32>
    %7 = arith.maximumf %5, %6 : vector<8x128xf32>
    %c0_6 = arith.constant 0 : index
    %c0_7 = arith.constant 0 : index
    %8 = vector.load %arg4[%c0_6, %c0_7] : memref<128x5xf32, #tpu.memory_space<vmem>>, vector<128x5xf32>
    %cst_8 = arith.constant dense<0.000000e+00> : vector<8x5xf32>
    %9 = tpu.matmul %7, %8, %cst_8 {dimension_numbers = #tpu.dot_dimension_numbers<[1], [0], [0], [1], [0, 0, 1, 1], [], []>} : vector<8x128xf32>, vector<128x5xf32>, vector<8x5xf32> -> vector<8x5xf32>
    %c0_9 = arith.constant 0 : index
    %c0_10 = arith.constant 0 : index
    %10 = vector.load %arg5[%c0_9, %c0_10] : memref<1x5xf32, #tpu.memory_space<vmem>>, vector<1x5xf32>
    %11 = vector.broadcast %10 : vector<1x5xf32> to vector<8x5xf32>
    %12 = arith.addf %9, %11 : vector<8x5xf32>
    %c0_11 = arith.constant 0 : index
    %c0_12 = arith.constant 0 : index
    %13 = vector.load %arg6[%c0_11, %c0_12] : memref<8x5xf32, #tpu.memory_space<vmem>>, vector<8x5xf32>
    tpu.vector_store %arg6[%c0_11, %c0_12], %12 {strides = array<i32>} : memref<8x5xf32, #tpu.memory_space<vmem>>, vector<8x5xf32>,
    return
  }
  func.func @transform_0(%arg0: i32) -> (i32, i32) {
    %c0_i32 = arith.constant 0 : i32
    %c0_i32_0 = arith.constant 0 : i32
    return %arg0, %c0_i32 : i32, i32
  }
  func.func @transform_1(%arg0: i32) -> (i32, i32) {
    %c0_i32 = arith.constant 0 : i32
    %c0_i32_0 = arith.constant 0 : i32
    %c0_i32_1 = arith.constant 0 : i32
    return %c0_i32, %c0_i32_0 : i32, i32
  }
  func.func @transform_2(%arg0: i32) -> (i32, i32) {
    %c0_i32 = arith.constant 0 : i32
    %c0_i32_0 = arith.constant 0 : i32
    %c0_i32_1 = arith.constant 0 : i32
    return %c0_i32, %c0_i32_0 : i32, i32
  }
  func.func @transform_3(%arg0: i32) -> (i32, i32) {
    %c0_i32 = arith.constant 0 : i32
    %c0_i32_0 = arith.constant 0 : i32
    %c0_i32_1 = arith.constant 0 : i32
    return %c0_i32, %c0_i32_0 : i32, i32
  }
  func.func @transform_4(%arg0: i32) -> (i32, i32) {
    %c0_i32 = arith.constant 0 : i32
    %c0_i32_0 = arith.constant 0 : i32
    %c0_i32_1 = arith.constant 0 : i32
    return %c0_i32, %c0_i32_0 : i32, i32
  }
  func.func @transform_5(%arg0: i32) -> (i32, i32) {
    %c0_i32 = arith.constant 0 : i32
    %c0_i32_0 = arith.constant 0 : i32
    return %arg0, %c0_i32 : i32, i32
  }
}

</mosaic_0001>

<bundles_post_ra>
// kernel: tpu_custom_call.1
= control target key start
LH: loop header
LB: loop body
LE: loop exit
PB: predicated region body
PF: predicated region fallthrough
CT: control target
= control target key end

     0   :  { %vm30_vm0 = vcmask 64512   ;;  %v328_v2 = vmov 0.0   ;;  %vm329_vm1 = vmmov 0   ;;  %v330_v6 = vmov 0.0|0.0   ;;  %s434_s0 = inlined_call_operand.vmem [shape: f32[8,8], index: 0, kind: input, shape index: {}]   ;;  %s435_s1 = inlined_call_operand.vmem [shape: f32[8,128], index: 1, kind: input, shape index: {}]   ;;  %s436_s2 = inlined_call_operand.vmem [shape: f32[1,128], index: 2, kind: input, shape index: {}]   ;;  %s437_s3 = inlined_call_operand.vmem [shape: f32[128,5], index: 3, kind: input, shape index: {}]   ;;  %s438_s4 = inlined_call_operand.vmem [shape: f32[1,5], index: 4, kind: input, shape index: {}]   ;;  %s439_s5 = inlined_call_operand.hbm [shape: f32[8,5], index: 5, kind: output, shape index: {}]  }
   0x1   :  { %v22_v0 = vld [vmem:[%s435_s1] sm:$0xff]  ;;  %236 = vmatprep.subr.mxu0 %v328_v2  ;;  %238 = vmatprep.mubr.msk.f32.mxu0 %vm329_vm1, %v328_v2  ;;  %v106_v4 = vld [vmem:[%s437_s3 + $0x8] sm:$0xff]  ;;  %v107_v5 = vld [vmem:[%s437_s3 + $0x10] sm:$0xff] }
   0x2   :  { %v21_v1 = vld [vmem:[%s434_s0] sm:$0xff]  ;;  %237 = vmatpush3.msra.mxu0 %v22_v0  ;;  %276 = vmatprep.subr.bf16.mxu1 %v330_v6  ;;  %v108_v8 = vld [vmem:[%s437_s3 + $0x18] sm:$0xff]  ;;  %v110_v11 = vld [vmem:[%s437_s3 + $0x28] sm:$0xff] }
   0x3   :  { %v105_v3 = vld [vmem:[%s437_s3] sm:$0xff]  ;;  %239 = vmatmul.mubr.msk.f32.vlgmr.msra.gmra.mrb[0].mxu0 %vm30_vm0, %v21_v1  ;;  %273 = vmatprep.mubr.msk.f32.mxu1 %vm329_vm1, %v328_v2  ;;  %v280_v9 = vpack.c.bf16 %v108_v8, %v107_v5 }
   0x4   :  { %v277_v7 = vpack.c.bf16 %v106_v4, %v105_v3  ;;  %v109_v10 = vld [vmem:[%s437_s3 + $0x20] sm:$0xff] }
   0x6   :  { %278 = vmatpush3.bf16.msra.mxu1 %v277_v7 }
   0x7   :  { %279 = vmatprep.subr.bf16.mxu1 %v330_v6 }
   0x8   :  { %10 = vsyncpa [#allocation3], 0  ;;  %v283_v12 = vpack.c.bf16 %v110_v11, %v109_v10  ;;  %v111_v13 = vld [vmem:[%s437_s3 + $0x30] sm:$0xff]  ;;  %v112_v14 = vld [vmem:[%s437_s3 + $0x38] sm:$0xff]  ;;  %s331_s29 = smov [#allocation2]   ;;  %vm198_vm2 = vcmask 39936  }
   0x9   :  { %v286_v15 = vpack.c.bf16 %v112_v14, %v111_v13  ;;  %v113_v16 = vld [vmem:[%s437_s3 + $0x40] sm:$0xff]  ;;  %v114_v17 = vld [vmem:[%s437_s3 + $0x48] sm:$0xff]  ;;  %v115_v19 = vld [vmem:[%s437_s3 + $0x50] sm:$0xff]  ;;  %s206_s30 = sshll.u32 %s331_s29, 4  ;;  %s207_s30 = int_to_ptr.vmem [resolvable:$true] %s206_s30 }
   0xa   :  { %281 = vmatpush3.bf16.msra.mxu1 %v280_v9  ;;  %v289_v18 = vpack.c.bf16 %v114_v17, %v113_v16  ;;  %v116_v20 = vld [vmem:[%s437_s3 + $0x58] sm:$0xff]  ;;  %v117_v22 = vld [vmem:[%s437_s3 + $0x60] sm:$0xff]  ;;  %v118_v23 = vld [vmem:[%s437_s3 + $0x68] sm:$0xff]  ;;  %p309_p1 = scmp.lt.s32.totalorder %s207_s30, %s207_s30 }
   0xb   :  { %282 = vmatprep.subr.bf16.mxu1 %v330_v6  ;;  %v292_v21 = vpack.c.bf16 %v116_v20, %v115_v19  ;;  %v295_v24 = vpack.c.bf16 %v118_v23, %v117_v22  ;;  %v119_v25 = vld [vmem:[%s437_s3 + $0x70] sm:$0xff]  ;;  %v120_v26 = vld [vmem:[%s437_s3 + $0x78] sm:$0xff]  ;;  %v214_v28 = vld [vmem:[%s436_s2] ss:$0 sm:$0xff]  ;;  %s304_s3 = scalar_lea.vmem %s207_s30, 128 }
   0xc   :  { %v298_v27 = vpack.c.bf16 %v120_v26, %v119_v25  ;;  %v216_v33 = vld [vmem:[%s438_s4] ss:$0 sm:$0xff]  ;;  %p305_p0 = scmp.ne.s32.totalorder %s207_s30, %s304_s3  ;;  %p310_p2 = scmp.lt.s32.totalorder %s304_s3, %s304_s3 }
   0xe   :  { %284 = vmatpush3.bf16.msra.mxu1 %v283_v12  ;;  %p311_p3 = por %p310_p2, %p309_p1 }
   0xf   :  { %285 = vmatprep.subr.bf16.mxu1 %v330_v6 }
  0x10   :  { %p312_p4 = pnand %p311_p3, %p305_p0 }
  0x12   :  { %287 = vmatpush3.bf16.msra.mxu1 %v286_v15 }
  0x13   :  { %288 = vmatprep.subr.bf16.mxu1 %v330_v6 }
  0x16   :  { %290 = vmatpush3.bf16.msra.mxu1 %v289_v18 }
  0x17   :  { %291 = vmatprep.subr.bf16.mxu1 %v330_v6 }
  0x1a   :  { %293 = vmatpush3.bf16.msra.mxu1 %v292_v21 }
  0x1b   :  { %294 = vmatprep.subr.bf16.mxu1 %v330_v6 }
  0x1e   :  { %296 = vmatpush3.bf16.msra.mxu1 %v295_v24 }
  0x1f   :  { %297 = vmatprep.subr.bf16.mxu1 %v330_v6 }
  0x22   :  { %299 = vmatpush3.bf16.msra.mxu1 %v298_v27 }
  0xd6   :  { %v100_v29 = vpop.f32.mrb[0].mxu0 }
  0xd7   :  { %v101_v30 = vadd.f32 %v214_v28, %v100_v29  ;;  %v240_v31 = vpop.f32.mrb[1].mxu0 }
  0xd9   :  { %v104_v32 = vmax.f32 %v101_v30, 0.0 }
  0xdb   :  { %274 = vmatmul.mubr.f32.vlgmr.msra.gmra.mrb[0].mxu1 %v104_v32 }
 0x1ae   :  { %v194_v34 = vpop.f32.mrb[0].mxu1 }
 0x1af   :  { %v195_v35 = vadd.f32 %v216_v33, %v194_v34  ;;  %v275_v36 = vpop.f32.mrb[1].mxu1 }
 0x1b1   :  { %199 = vst.msk [vmem:[#allocation2] sm:$0xff] %vm198_vm2, %v195_v35 }
 0x1b2   :  { %315 = shalt.err (!%p312_p4)
}
 0x1b3   :  { %s316_s7 = scalar_lea.hbm %s439_s5, 128 }
 0x1b4   :  { %p317_p5 = scmp.ne.s32.totalorder %s439_s5, %s316_s7  ;;  %p320_p6 = scmp.lt.u32.totalorder %s316_s7, %s439_s5 }
 0x1b6   :  { %p322_p7 = pnand %p320_p6, %p317_p5 }
 0x1b8   :  { %325 = shalt.err (!%p322_p7)
}
 0x1b9   :  { %209 = dma.vmem_to_hbm [thread:$0]  %s207_s30, 128, %s439_s5, [#allocation3]  }
 0x1ba   :  { %326 = dma.done.wait [#allocation3], 128  }
 0x1bb   :  { %327 = vsyncadd [#allocation3], 4294967168 }
 0x1bc   :  { %213 = vsyncpa [#allocation3], 1 }

</bundles_post_ra>
